<compile_context>
chip_gen: v6e
topology: v6e:2x2x1
jax: 0.10.0
libtpu: 0.0.40
codegen_flags: <defaults>
</compile_context>

<pallas_src>
import jax
import jax.numpy as jnp
from jax.experimental import pallas as pl
from jax.experimental.pallas import tpu as pltpu


# ----------------------------- Pallas kernel --------------------------------
def sn_discriminator_kernel(x_ref, w1_ref, b1_ref, w2_ref, b2_ref,
                            w3p_ref, b3_ref, out_ref):
    # layer 1: tanh(x @ W1 + b1)   (TB, F)bf16 @ (F, H1)bf16 -> (TB, H1)f32
    h = jnp.dot(x_ref[...], w1_ref[...], preferred_element_type=jnp.float32)
    h = jnp.tanh(h + b1_ref[...])                 # f32 bias add + tanh (EUP)
    h = h.astype(jnp.bfloat16)                    # bf16 intermediate

    # layer 2: tanh(h @ W2 + b2)   (TB, H1)bf16 @ (H1, H2)bf16 -> (TB, H2)f32
    h = jnp.dot(h, w2_ref[...], preferred_element_type=jnp.float32)
    h = jnp.tanh(h + b2_ref[...])
    h = h.astype(jnp.bfloat16)

    # logic layer, computed as A.B^T so per-tile logits come out lane-dense:
    #   (16, H2)bf16 contracted with (TB, H2)bf16 on last dim -> (16, TB)f32;
    #   only row 0 of w3p is the real weight row, rows 1..15 are zero padding.
    p = jax.lax.dot_general(
        w3p_ref[...], h,
        dimension_numbers=(((1,), (1,)), ((), ())),
        preferred_element_type=jnp.float32)
    out_ref[...] = (p[0:1, :] + b3_ref[0, 0]).astype(out_ref.dtype)


# ------------------------------- wrapper -------------------------------------
def _round_up(n, m):
    return ((n + m - 1) // m) * m


def _num_tensorcores():
    """2 on v7x (megacore split of the 'parallel' batch axis), else 1."""
    try:
        kind = jax.devices()[0].device_kind.lower()
        return 2 if "v7" in kind else 1
    except Exception:  # pragma: no cover - conservative fallback
        return 1


def sn_discriminator_forward(x, params, *, block_b=2048):
    """x: (B, num_inputs) f32.  params: spectral-normalized, pre-transposed weights."""
    x = jnp.asarray(x, jnp.float32)
    B, F = x.shape
    w1, b1 = params["w1"], params["b1"]      # (F, H1) bf16, (1, H1) f32
    w2, b2 = params["w2"], params["b2"]      # (H1, H2) bf16, (1, H2) f32
    w3p, b3 = params["w3p"], params["b3"]    # (16, H2) bf16 row-padded, (1, 1) f32
    H1, H2 = w1.shape[1], w2.shape[1]

    # Batch tile: multiple of 128 (lane-dense output row).
    block_b = _round_up(block_b, 128)
    b_align = _round_up(B, 128)
    TB = min(block_b, b_align)
    # v7x: keep nb >= 2 so the parallel batch axis can shard across both cores.
    if _num_tensorcores() >= 2 and b_align >= 2 * 128:
        TB = min(TB, _round_up(pl.cdiv(b_align, 2), 128))
    Bp = _round_up(B, TB)
    nb = Bp // TB

    # bf16 matmul operands (f32 accumulation inside the kernel).
    xb = x.astype(jnp.bfloat16)
    if Bp != B:
        xb = jnp.pad(xb, ((0, Bp - B), (0, 0)))

    weight_bytes = (w1.size + w2.size + w3p.size) * 2 + (b1.size + b2.size + 1) * 4
    cost = pl.CostEstimate(
        flops=2 * Bp * (F * H1 + H1 * H2 + H2),
        transcendentals=Bp * (H1 + H2),
        bytes_accessed=Bp * (F * 2 + 4) + weight_bytes,
    )

    out = pl.pallas_call(
        sn_discriminator_kernel,
        out_shape=jax.ShapeDtypeStruct((nb, 1, TB), jnp.float32),
        grid=(nb,),
        in_specs=[
            # streamed activation tile (double-buffered by the Pallas pipeline)
            pl.BlockSpec((TB, F), lambda i: (i, 0)),
            # weights/biases: same block every step -> DMA'd once, VMEM-resident
            pl.BlockSpec((F, H1), lambda i: (0, 0)),
            pl.BlockSpec((1, H1), lambda i: (0, 0)),
            pl.BlockSpec((H1, H2), lambda i: (0, 0)),
            pl.BlockSpec((1, H2), lambda i: (0, 0)),
            pl.BlockSpec((16, H2), lambda i: (0, 0)),
            # scalar bias of the logic layer lives in SMEM (no padded VMEM tile)
            pl.BlockSpec(memory_space=pltpu.MemorySpace.SMEM),
        ],
        # lane-dense (1, TB) logit slab per grid step; leading dim squeezed
        out_specs=pl.BlockSpec((None, 1, TB), lambda i: (i, 0, 0)),
        compiler_params=pltpu.CompilerParams(
            dimension_semantics=("parallel",),
        ),
        cost_estimate=cost,
    )(xb, w1, b1, w2, b2, w3p, b3)

    # (nb, 1, TB) row-major -> (Bp, 1), drop padding rows.
    return out.reshape(-1, 1)[:B]


# ------------------------- parameter setup (glue) ---------------------------
def _l2normalize(v, eps=1e-12):
    return v / (jnp.sqrt(jnp.sum(v * v)) + eps)


def spectral_normalize(w, u, n_power_iterations=1):
    """w: (out, in) PyTorch-layout weight. One power iteration -> w / sigma."""
    for _ in range(n_power_iterations):
        v = _l2normalize(w.T @ u)
        u = _l2normalize(w @ v)
    sigma = u @ (w @ v)
    return w / sigma, u


def make_linear_params(key, fan_in, fan_out):
    """Deterministic init mimicking nn.Linear default (uniform +-1/sqrt(fan_in))."""
    kw, kb, ku = jax.random.split(key, 3)
    bound = 1.0 / jnp.sqrt(fan_in)
    w = jax.random.uniform(kw, (fan_out, fan_in), jnp.float32, -bound, bound)
    b = jax.random.uniform(kb, (fan_out,), jnp.float32, -bound, bound)
    u = jax.random.normal(ku, (fan_out,), jnp.float32)
    return w, b, u


def build_sn_discriminator_params(key, num_inputs, hidden_size=(128, 128)):
    dims = [num_inputs] + list(hidden_size) + [1]
    n_layers = len(dims) - 1
    keys = jax.random.split(key, n_layers)
    params = {}
    for i, (fi, fo) in enumerate(zip(dims[:-1], dims[1:]), start=1):
        w, b, u = make_linear_params(keys[i - 1], fi, fo)
        w_sn, _ = spectral_normalize(w, u)                    # (out, in) / sigma
        if i < n_layers:
            # store transposed (in, out); matmul operands in bf16, bias f32
            params[f"w{i}"] = jnp.asarray(w_sn.T, jnp.bfloat16)
            params[f"b{i}"] = jnp.asarray(b[None, :], jnp.float32)
        else:
            # final 1-unit layer: keep PyTorch (out, in) row layout, padded to
            # 16 rows so the in-kernel A.B^T matmul has a bf16-tile-aligned M dim.
            w3p = jnp.zeros((16, fi), jnp.float32).at[0].set(w_sn[0])
            params["w3p"] = jnp.asarray(w3p, jnp.bfloat16)
            params["b3"] = jnp.asarray(b, jnp.float32).reshape(1, 1)
    return params


def reference_forward(x, params):
    """Pure-JAX reference with the same bf16-operand / f32-accumulate numerics."""
    xb = jnp.asarray(x, jnp.bfloat16)
    h = jnp.dot(xb, params["w1"], preferred_element_type=jnp.float32)
    h = jnp.tanh(h + params["b1"]).astype(jnp.bfloat16)
    h = jnp.dot(h, params["w2"], preferred_element_type=jnp.float32)
    h = jnp.tanh(h + params["b2"]).astype(jnp.bfloat16)
    w3 = params["w3p"][0:1, :].T                              # (H2, 1) bf16
    return jnp.dot(h, w3, preferred_element_type=jnp.float32) + params["b3"]


# ---------------------------------- main -------------------------------------
if __name__ == "__main__":
    key = jax.random.PRNGKey(0)
    k_x, k_p = jax.random.split(key)

    num_inputs = 16
    hidden_size = (128, 128)   # module default
    params = build_sn_discriminator_params(k_p, num_inputs, hidden_size)

    # Small batch (single tile).
    batch = 64
    x = jax.random.normal(k_x, (batch, num_inputs), jnp.float32)
    prob = jax.block_until_ready(sn_discriminator_forward(x, params))
    ref = reference_forward(x, params)
    assert prob.shape == (batch, 1)
    assert jnp.allclose(prob, ref, atol=2e-3, rtol=2e-3), \
        float(jnp.max(jnp.abs(prob - ref)))

    # Non-tile-aligned batch: exercises the padding path.
    x_small = x[:50]
    prob_small = jax.block_until_ready(sn_discriminator_forward(x_small, params))
    ref_small = reference_forward(x_small, params)
    assert prob_small.shape == (50, 1)
    assert jnp.allclose(prob_small, ref_small, atol=2e-3, rtol=2e-3), \
        float(jnp.max(jnp.abs(prob_small - ref_small)))

    # Multi-step grid (nb = 2) with a forced smaller tile.
    x_big = jax.random.normal(jax.random.PRNGKey(1), (512, num_inputs), jnp.float32)
    prob_big = jax.block_until_ready(
        sn_discriminator_forward(x_big, params, block_b=256))
    ref_big = reference_forward(x_big, params)
    assert prob_big.shape == (512, 1)
    assert jnp.allclose(prob_big, ref_big, atol=2e-3, rtol=2e-3), \
        float(jnp.max(jnp.abs(prob_big - ref_big)))

    print("KERNEL_OK")
</pallas_src>

<mosaic_0001>
module attributes {stable_mosaic.version = 11 : i64} {
  func.func @sn_discriminator_kernel(%arg0: i32, %arg1: memref<128x16xbf16, #tpu.memory_space<vmem>>, %arg2: memref<16x128xbf16, #tpu.memory_space<vmem>>, %arg3: memref<1x128xf32, #tpu.memory_space<vmem>>, %arg4: memref<128x128xbf16, #tpu.memory_space<vmem>>, %arg5: memref<1x128xf32, #tpu.memory_space<vmem>>, %arg6: memref<16x128xbf16, #tpu.memory_space<vmem>>, %arg7: memref<1x1xf32, #tpu.memory_space<smem>>, %arg8: memref<1x1x128xf32, #tpu.memory_space<vmem>>) attributes {dimension_semantics = [#tpu.dimension_semantics<parallel>], iteration_bounds = array<i64: 1>, scalar_prefetch = 0 : i64, scratch_operands = 0 : i64, tpu.core_type = #tpu.core_type<tc>, window_params = [{transform_indices = @transform_0, window_bounds = array<i64: 128, 16>}, {pipeline_mode = #tpu.pipeline_mode<synchronous>, transform_indices = @transform_1, window_bounds = array<i64: 16, 128>}, {pipeline_mode = #tpu.pipeline_mode<synchronous>, transform_indices = @transform_2, window_bounds = array<i64: 1, 128>}, {pipeline_mode = #tpu.pipeline_mode<synchronous>, transform_indices = @transform_3, window_bounds = array<i64: 128, 128>}, {pipeline_mode = #tpu.pipeline_mode<synchronous>, transform_indices = @transform_4, window_bounds = array<i64: 1, 128>}, {pipeline_mode = #tpu.pipeline_mode<synchronous>, transform_indices = @transform_5, window_bounds = array<i64: 16, 128>}, {transform_indices = @transform_6, window_bounds = array<i64: 1, 1>}, {transform_indices = @transform_7, window_bounds = array<i64: 1, 1, 128>}]} {
    %c0 = arith.constant 0 : index
    %c0_0 = arith.constant 0 : index
    %0 = vector.load %arg1[%c0, %c0_0] : memref<128x16xbf16, #tpu.memory_space<vmem>>, vector<128x16xbf16>
    %c0_1 = arith.constant 0 : index
    %c0_2 = arith.constant 0 : index
    %1 = vector.load %arg2[%c0_1, %c0_2] : memref<16x128xbf16, #tpu.memory_space<vmem>>, vector<16x128xbf16>
    %cst = arith.constant dense<0.000000e+00> : vector<128x128xf32>
    %2 = tpu.matmul %0, %1, %cst {dimension_numbers = #tpu.dot_dimension_numbers<[1], [0], [0], [1], [0, 0, 1, 1], [], []>} : vector<128x16xbf16>, vector<16x128xbf16>, vector<128x128xf32> -> vector<128x128xf32>
    %c0_3 = arith.constant 0 : index
    %c0_4 = arith.constant 0 : index
    %3 = vector.load %arg3[%c0_3, %c0_4] : memref<1x128xf32, #tpu.memory_space<vmem>>, vector<1x128xf32>
    %4 = vector.broadcast %3 : vector<1x128xf32> to vector<128x128xf32>
    %5 = arith.addf %2, %4 : vector<128x128xf32>
    %6 = math.tanh %5 : vector<128x128xf32>
    %7 = arith.truncf %6 : vector<128x128xf32> to vector<128x128xbf16>
    %c0_5 = arith.constant 0 : index
    %c0_6 = arith.constant 0 : index
    %8 = vector.load %arg4[%c0_5, %c0_6] : memref<128x128xbf16, #tpu.memory_space<vmem>>, vector<128x128xbf16>
    %cst_7 = arith.constant dense<0.000000e+00> : vector<128x128xf32>
    %9 = tpu.matmul %7, %8, %cst_7 {dimension_numbers = #tpu.dot_dimension_numbers<[1], [0], [0], [1], [0, 0, 1, 1], [], []>} : vector<128x128xbf16>, vector<128x128xbf16>, vector<128x128xf32> -> vector<128x128xf32>
    %c0_8 = arith.constant 0 : index
    %c0_9 = arith.constant 0 : index
    %10 = vector.load %arg5[%c0_8, %c0_9] : memref<1x128xf32, #tpu.memory_space<vmem>>, vector<1x128xf32>
    %11 = vector.broadcast %10 : vector<1x128xf32> to vector<128x128xf32>
    %12 = arith.addf %9, %11 : vector<128x128xf32>
    %13 = math.tanh %12 : vector<128x128xf32>
    %14 = arith.truncf %13 : vector<128x128xf32> to vector<128x128xbf16>
    %c0_10 = arith.constant 0 : index
    %c0_11 = arith.constant 0 : index
    %15 = vector.load %arg6[%c0_10, %c0_11] : memref<16x128xbf16, #tpu.memory_space<vmem>>, vector<16x128xbf16>
    %cst_12 = arith.constant dense<0.000000e+00> : vector<16x128xf32>
    %16 = tpu.matmul %15, %14, %cst_12 {dimension_numbers = #tpu.dot_dimension_numbers<[1], [1], [0], [0], [0, 0, 1, 0], [], []>} : vector<16x128xbf16>, vector<128x128xbf16>, vector<16x128xf32> -> vector<16x128xf32>
    %17 = vector.extract_strided_slice %16 {offsets = [0, 0], sizes = [1, 128], strides = [1, 1]} : vector<16x128xf32> to vector<1x128xf32>
    %c0_13 = arith.constant 0 : index
    %c0_14 = arith.constant 0 : index
    %18 = memref.load %arg7[%c0_13, %c0_14] : memref<1x1xf32, #tpu.memory_space<smem>>
    %19 = vector.broadcast %18 : f32 to vector<1x128xf32>
    %20 = arith.addf %17, %19 : vector<1x128xf32>
    %c0_15 = arith.constant 0 : index
    %c0_16 = arith.constant 0 : index
    %c0_17 = arith.constant 0 : index
    %21 = vector.load %arg8[%c0_15, %c0_16, %c0_17] : memref<1x1x128xf32, #tpu.memory_space<vmem>>, vector<1x1x128xf32>
    %22 = vector.shape_cast %21 : vector<1x1x128xf32> to vector<1x128xf32>
    %23 = vector.shape_cast %20 : vector<1x128xf32> to vector<1x1x128xf32>
    tpu.vector_store %arg8[%c0_15, %c0_16, %c0_17], %23 {strides = array<i32>} : memref<1x1x128xf32, #tpu.memory_space<vmem>>, vector<1x1x128xf32>,
    return
  }
  func.func @transform_0(%arg0: i32) -> (i32, i32) {
    %c0_i32 = arith.constant 0 : i32
    %c0_i32_0 = arith.constant 0 : i32
    return %arg0, %c0_i32 : i32, i32
  }
  func.func @transform_1(%arg0: i32) -> (i32, i32) {
    %c0_i32 = arith.constant 0 : i32
    %c0_i32_0 = arith.constant 0 : i32
    %c0_i32_1 = arith.constant 0 : i32
    return %c0_i32, %c0_i32_0 : i32, i32
  }
  func.func @transform_2(%arg0: i32) -> (i32, i32) {
    %c0_i32 = arith.constant 0 : i32
    %c0_i32_0 = arith.constant 0 : i32
    %c0_i32_1 = arith.constant 0 : i32
    return %c0_i32, %c0_i32_0 : i32, i32
  }
  func.func @transform_3(%arg0: i32) -> (i32, i32) {
    %c0_i32 = arith.constant 0 : i32
    %c0_i32_0 = arith.constant 0 : i32
    %c0_i32_1 = arith.constant 0 : i32
    return %c0_i32, %c0_i32_0 : i32, i32
  }
  func.func @transform_4(%arg0: i32) -> (i32, i32) {
    %c0_i32 = arith.constant 0 : i32
    %c0_i32_0 = arith.constant 0 : i32
    %c0_i32_1 = arith.constant 0 : i32
    return %c0_i32, %c0_i32_0 : i32, i32
  }
  func.func @transform_5(%arg0: i32) -> (i32, i32) {
    %c0_i32 = arith.constant 0 : i32
    %c0_i32_0 = arith.constant 0 : i32
    %c0_i32_1 = arith.constant 0 : i32
    return %c0_i32, %c0_i32_0 : i32, i32
  }
  func.func @transform_6(%arg0: i32) -> (i32, i32) {
    %c0_i32 = arith.constant 0 : i32
    %c0_i32_0 = arith.constant 0 : i32
    %c0_i32_1 = arith.constant 0 : i32
    return %c0_i32, %c0_i32_0 : i32, i32
  }
  func.func @transform_7(%arg0: i32) -> (i32, i32, i32) {
    %c0_i32 = arith.constant 0 : i32
    %c0_i32_0 = arith.constant 0 : i32
    %c0_i32_1 = arith.constant 0 : i32
    return %arg0, %c0_i32, %c0_i32_0 : i32, i32, i32
  }
}

</mosaic_0001>

<bundles_post_ra>
// kernel: tpu_custom_call.1
= control target key start
LH: loop header
LB: loop body
LE: loop exit
PB: predicated region body
PF: predicated region fallthrough
CT: control target
= control target key end

     0   :  { %13 = vsyncpa [#allocation4], 0  ;;  %s936_s0 = inlined_call_operand.vmem [shape: bf16[128,16], index: 0, kind: input, shape index: {}]   ;;  %s937_s1 = inlined_call_operand.vmem [shape: bf16[16,128], index: 1, kind: input, shape index: {}]   ;;  %s938_s2 = inlined_call_operand.vmem [shape: f32[1,128], index: 2, kind: input, shape index: {}]   ;;  %s939_s3 = inlined_call_operand.vmem [shape: bf16[128,128], index: 3, kind: input, shape index: {}]   ;;  %s940_s4 = inlined_call_operand.hbm [shape: f32[1,128], index: 4, kind: input, shape index: {}]   ;;  %s941_s5 = inlined_call_operand.vmem [shape: bf16[16,128], index: 5, kind: input, shape index: {}]   ;;  %s942_s6 = inlined_call_operand.<no memory space> [shape: f32[1,1], index: 6, kind: input, shape index: {}]   ;;  %s943_s7 = inlined_call_operand.hbm [shape: f32[1,1,128], index: 7, kind: output, shape index: {}]  }
   0x1   :  { %14 = vsyncpa [#allocation5], 0  ;;  %s779_s24 = smov [#allocation3]  }
   0x2   :  { %s29_s25 = sshll.u32 %s779_s24, 4  ;;  %s30_s25 = int_to_ptr.vmem [resolvable:$true] %s29_s25 }
   0x3   :  { %s743_s26 = scalar_lea.vmem %s30_s25, 16  ;;  %s747_s27 = scalar_lea.vmem %s30_s25, 32 }
   0x4   :  { %p744_p0 = scmp.ne.s32.totalorder %s30_s25, %s743_s26  ;;  %p748_p1 = scmp.lt.s32.totalorder %s30_s25, %s30_s25 }
   0x5   :  { %p749_p2 = scmp.lt.s32.totalorder %s747_s27, %s743_s26 }
   0x7   :  { %p750_p3 = por %p749_p2, %p748_p1 }
   0x9   :  { %p751_p4 = pnand %p750_p3, %p744_p0 }
   0xb   :  { %754 = shalt.err (!%p751_p4)
}
   0xc   :  { %32 = dma.hbm_to_vmem [thread:$0]  %s940_s4, 16, %s30_s25, [#allocation4]  }
   0xd   :  { %775 = dma.done.wait [#allocation4], 16  }
   0xe   :  { %776 = vsyncadd [#allocation4], 4294967280  ;;  %v653_v0 = vld [vmem:[%s937_s1] sm:$0xff]   ;;  %vm112_vm0 = vcmask 130048   ;;  %v655_v2 = vld [vmem:[%s936_s0 + $0x8] sm:$0xff]   ;;  %vm781_vm1 = vmmov 0  }
   0xf   :  { %v654_v1 = vld [vmem:[%s936_s0] sm:$0xff]   ;;  %579 = vmatprep.subr.bf16.mxu1 %v653_v0  ;;  %v656_v3 = vld [vmem:[%s936_s0 + $0x10] sm:$0xff]   ;;  %v657_v4 = vld [vmem:[%s936_s0 + $0x18] sm:$0xff]   ;;  %s782_s17 = smov [#allocation6]  }
  0x10   :  { %580 = vmatpush3.bf16.msra.mxu1 %v653_v0  ;;  %581 = vmatprep.mubr.msk.bf16.mxu1 %vm112_vm0, %v654_v1  ;;  %v658_v5 = vld [vmem:[%s936_s0 + $0x20] sm:$0xff]   ;;  %v662_v6 = vld [vmem:[%s939_s3 + $0x38] sm:$0xff]   ;;  %v663_v7 = vld [vmem:[%s939_s3 + $0x30] sm:$0xff]   ;;  %s508_s18 = sshll.u32 %s782_s17, 4  ;;  %s509_s18 = int_to_ptr.vmem [resolvable:$true] %s508_s18 }
  0x11   :  { %597 = vmatprep.subr.bf16.mxu1 %v662_v6  ;;  %v659_v8 = vld [vmem:[%s936_s0 + $0x28] sm:$0xff]   ;;  %v660_v9 = vld [vmem:[%s936_s0 + $0x30] sm:$0xff]   ;;  %v661_v10 = vld [vmem:[%s936_s0 + $0x38] sm:$0xff]   ;;  %s755_s19 = scalar_lea.vmem %s509_s18, 16  ;;  %s759_s20 = scalar_lea.vmem %s509_s18, 32 }
  0x12   :  { %v664_v11 = vld [vmem:[%s939_s3 + $0x28] sm:$0xff]   ;;  %v665_v12 = vld [vmem:[%s939_s3 + $0x20] sm:$0xff]   ;;  %v666_v13 = vld [vmem:[%s939_s3 + $0x18] sm:$0xff]   ;;  %p756_p5 = scmp.ne.s32.totalorder %s509_s18, %s755_s19  ;;  %p760_p6 = scmp.lt.s32.totalorder %s509_s18, %s509_s18 }
  0x13   :  { %582 = vmatmul.mubr.msk.bf16.vlgmr.msra.gmra.mxu1 %vm112_vm0, %v655_v2  ;;  %v667_v14 = vld [vmem:[%s939_s3 + $0x10] sm:$0xff]   ;;  %v668_v15 = vld [vmem:[%s939_s3 + $0x8] sm:$0xff]   ;;  %v669_v16 = vld [vmem:[%s939_s3] sm:$0xff]   ;;  %p761_p7 = scmp.lt.s32.totalorder %s759_s20, %s755_s19 }
  0x14   :  { %585 = vmatprep.mubr.msk.bf16.mxu1 %vm112_vm0, %v656_v3  ;;  %598 = vmatpush3.bf16.msra.mxu1 %v662_v6  ;;  %v517_v18 = vld [vmem:[%s938_s2] ss:$0 sm:$0xff] }
  0x15   :  { %599 = vmatprep.subr.bf16.mxu1 %v663_v7  ;;  %p762_p8 = por %p761_p7, %p760_p6 }
  0x17   :  { %p763_p9 = pnand %p762_p8, %p756_p5 }
  0x18   :  { %600 = vmatpush3.bf16.msra.mxu1 %v663_v7 }
  0x19   :  { %601 = vmatprep.subr.bf16.mxu1 %v664_v11 }
  0x1b   :  { %586 = vmatmul.mubr.msk.bf16.gmra.mxu1 %vm112_vm0, %v657_v4 }
  0x1c   :  { %589 = vmatprep.mubr.msk.bf16.mxu1 %vm112_vm0, %v658_v5  ;;  %602 = vmatpush3.bf16.msra.mxu1 %v664_v11  ;;  %v890_v11 = vld [vmem:[#allocation3] ss:$0 sm:$0xff] }
  0x1d   :  { %603 = vmatprep.subr.bf16.mxu1 %v665_v12 }
  0x20   :  { %604 = vmatpush3.bf16.msra.mxu1 %v665_v12 }
  0x21   :  { %605 = vmatprep.subr.bf16.mxu1 %v666_v13 }
  0x23   :  { %590 = vmatmul.mubr.msk.bf16.gmra.mxu1 %vm112_vm0, %v659_v8 }
  0x24   :  { %593 = vmatprep.mubr.msk.bf16.mxu1 %vm112_vm0, %v660_v9  ;;  %606 = vmatpush3.bf16.msra.mxu1 %v666_v13 }
  0x25   :  { %607 = vmatprep.subr.bf16.mxu1 %v667_v14 }
  0x28   :  { %608 = vmatpush3.bf16.msra.mxu1 %v667_v14 }
  0x29   :  { %609 = vmatprep.subr.bf16.mxu1 %v668_v15 }
  0x2b   :  { %594 = vmatmul.mubr.msk.bf16.gmra.mxu1 %vm112_vm0, %v661_v10  ;;  %v780_v10 = vmov 0.0  }
  0x2c   :  { %610 = vmatpush3.bf16.msra.mxu1 %v668_v15  ;;  %629 = vmatprep.subr.bf16.mxu0 %v780_v10 }
  0x2d   :  { %611 = vmatprep.subr.bf16.mxu1 %v669_v16  ;;  %645 = vmatprep.mubr.msk.bf16.mxu0 %vm781_vm1, %v780_v10 }
  0x30   :  { %612 = vmatpush3.bf16.msra.mxu1 %v669_v16 }
  0xd3   :  { %v583_v17 = vpop.f32.mrf.mxu1 }
  0xd4   :  { %v180_v23 = vadd.f32 %v583_v17, %v517_v18 }
  0xd5   :  { %v171_v19 = vpop.f32.mrf.mxu1 }
  0xd6   :  { %v172_v20 = vadd.f32 %v517_v18, %v171_v19 }
  0xd7   :  { %v584_v21 = vpop.f32.mrf.mxu1 }
  0xd8   :  { %v183_v22 = vadd.f32 %v584_v21, %v517_v18  ;;  %671 = vtanh.f32 %v172_v20 }
  0xd9   :  { %v174_v24 = vpop.f32.mrf.mxu1 }
  0xda   :  { %v175_v25 = vadd.f32 %v517_v18, %v174_v24  ;;  %673 = vtanh.f32 %v183_v22 }
  0xdb   :  { %v587_v26 = vpop.f32.mrf.mxu1 }
  0xdc   :  { %675 = vtanh.f32 %v175_v25  ;;  %v196_v31 = vadd.f32 %v587_v26, %v517_v18 }
  0xdd   :  { %677 = vtanh.f32 %v180_v23  ;;  %v187_v27 = vpop.f32.mrf.mxu1 }
  0xde   :  { %v188_v28 = vadd.f32 %v517_v18, %v187_v27 }
  0xdf   :  { %v588_v29 = vpop.f32.mrf.mxu1 }
  0xe0   :  { %v199_v30 = vadd.f32 %v588_v29, %v517_v18  ;;  %679 = vtanh.f32 %v188_v28 }
  0xe1   :  { %v190_v32 = vpop.f32.mrf.mxu1 }
  0xe2   :  { %v191_v33 = vadd.f32 %v517_v18, %v190_v32  ;;  %681 = vtanh.f32 %v199_v30 }
  0xe3   :  { %v591_v34 = vpop.f32.mrf.mxu1 }
  0xe4   :  { %683 = vtanh.f32 %v191_v33  ;;  %v212_v42 = vadd.f32 %v591_v34, %v517_v18 }
  0xe5   :  { %685 = vtanh.f32 %v196_v31  ;;  %v203_v35 = vpop.f32.mrf.mxu1  ;;  %v672_v37 = vpop.eup %671 }
  0xe6   :  { %v204_v36 = vadd.f32 %v517_v18, %v203_v35 }
  0xe7   :  { %v592_v38 = vpop.f32.mrf.mxu1  ;;  %v674_v39 = vpop.eup %673 }
  0xe8   :  { %v215_v40 = vadd.f32 %v592_v38, %v517_v18  ;;  %687 = vtanh.f32 %v204_v36 }
  0xe9   :  { %v676_v41 = vpop.eup %675  ;;  %v206_v43 = vpop.f32.mrf.mxu1 }
  0xea   :  { %v678_v44 = vpop.eup %677  ;;  %v207_v45 = vadd.f32 %v517_v18, %v206_v43  ;;  %v250_v46 = vpack.c.bf16 %v676_v41, %v672_v37  ;;  %689 = vtanh.f32 %v215_v40 }
  0xeb   :  { %v595_v47 = vpop.f32.mrf.mxu1  ;;  %v251_v48 = vpack.c.bf16 %v674_v39, %v678_v44 }
  0xec   :  { %691 = vtanh.f32 %v207_v45  ;;  %613 = vmatprep.mubr.bf16.mxu1 %v250_v46  ;;  %v228_v56 = vadd.f32 %v595_v47, %v517_v18 }
  0xed   :  { %693 = vtanh.f32 %v212_v42  ;;  %v219_v49 = vpop.f32.mrf.mxu1  ;;  %614 = vmatmul.mubr.bf16.vlgmr.msra.gmra.mxu1 %v251_v48  ;;  %v680_v51 = vpop.eup %679 }
  0xee   :  { %v220_v50 = vadd.f32 %v517_v18, %v219_v49 }
  0xef   :  { %v596_v52 = vpop.f32.mrf.mxu1  ;;  %v682_v53 = vpop.eup %681 }
  0xf0   :  { %v231_v54 = vadd.f32 %v596_v52, %v517_v18  ;;  %695 = vtanh.f32 %v220_v50 }
  0xf1   :  { %v684_v55 = vpop.eup %683  ;;  %v222_v57 = vpop.f32.mrf.mxu1 }
  0xf2   :  { %v686_v58 = vpop.eup %685  ;;  %v223_v59 = vadd.f32 %v517_v18, %v222_v57  ;;  %v252_v60 = vpack.c.bf16 %v684_v55, %v680_v51  ;;  %697 = vtanh.f32 %v231_v54 }
  0xf3   :  { %v253_v61 = vpack.c.bf16 %v682_v53, %v686_v58 }
  0xf4   :  { %699 = vtanh.f32 %v223_v59  ;;  %617 = vmatprep.mubr.bf16.mxu1 %v252_v60 }
  0xf5   :  { %701 = vtanh.f32 %v228_v56  ;;  %618 = vmatmul.mubr.bf16.gmra.mxu1 %v253_v61  ;;  %v688_v62 = vpop.eup %687 }
  0xf7   :  { %v690_v63 = vpop.eup %689 }
  0xf9   :  { %v692_v0 = vpop.eup %691 }
  0xfa   :  { %v694_v1 = vpop.eup %693  ;;  %v254_v2 = vpack.c.bf16 %v692_v0, %v688_v62 }
  0xfb   :  { %v255_v3 = vpack.c.bf16 %v690_v63, %v694_v1 }
  0xfc   :  { %621 = vmatprep.mubr.bf16.mxu1 %v254_v2 }
  0xfd   :  { %622 = vmatmul.mubr.bf16.gmra.mxu1 %v255_v3  ;;  %v696_v4 = vpop.eup %695 }
  0xff   :  { %v698_v5 = vpop.eup %697 }
 0x101   :  { %v700_v6 = vpop.eup %699 }
 0x102   :  { %v702_v7 = vpop.eup %701  ;;  %v256_v8 = vpack.c.bf16 %v700_v6, %v696_v4  ;;  %v670_v4 = vld [vmem:[%s941_s5] sm:$0xff]  }
 0x103   :  { %v257_v9 = vpack.c.bf16 %v698_v5, %v702_v7  ;;  %v499_v5 = vstv %s942_s6 }
 0x104   :  { %625 = vmatprep.mubr.bf16.mxu1 %v256_v8 }
 0x105   :  { %626 = vmatmul.mubr.bf16.gmra.mxu1 %v257_v9 }
 0x1ad   :  { %v615_v12 = vpop.f32.mrf.mxu1 }
 0x1ae   :  { %v372_v13 = vadd.f32 %v615_v12, %v890_v11 }
 0x1af   :  { %v363_v14 = vpop.f32.mrf.mxu1 }
 0x1b0   :  { %v364_v15 = vadd.f32 %v890_v11, %v363_v14  ;;  %703 = vtanh.f32 %v372_v13 }
 0x1b1   :  { %v616_v16 = vpop.f32.mrf.mxu1 }
 0x1b2   :  { %v375_v17 = vadd.f32 %v616_v16, %v890_v11 }
 0x1b3   :  { %v366_v18 = vpop.f32.mrf.mxu1 }
 0x1b4   :  { %705 = vtanh.f32 %v375_v17  ;;  %v367_v19 = vadd.f32 %v890_v11, %v366_v18 }
 0x1b5   :  { %707 = vtanh.f32 %v364_v15  ;;  %v619_v20 = vpop.f32.mrf.mxu1 }
 0x1b6   :  { %709 = vtanh.f32 %v367_v19  ;;  %v388_v54 = vadd.f32 %v619_v20, %v890_v11 }
 0x1b7   :  { %v379_v21 = vpop.f32.mrf.mxu1 }
 0x1b8   :  { %v380_v59 = vadd.f32 %v890_v11, %v379_v21 }
 0x1b9   :  { %v620_v22 = vpop.f32.mrf.mxu1 }
 0x1ba   :  { %v391_v52 = vadd.f32 %v620_v22, %v890_v11 }
 0x1bb   :  { %v382_v23 = vpop.f32.mrf.mxu1 }
 0x1bc   :  { %v383_v57 = vadd.f32 %v890_v11, %v382_v23 }
 0x1bd   :  { %v623_v24 = vpop.f32.mrf.mxu1  ;;  %v896_v26 = vpop.eup %703 }
 0x1be   :  { %v404_v44 = vadd.f32 %v623_v24, %v890_v11 }
 0x1bf   :  { %v395_v25 = vpop.f32.mrf.mxu1 }
 0x1c0   :  { %v396_v49 = vadd.f32 %v890_v11, %v395_v25 }
 0x1c1   :  { %v898_v27 = vpop.eup %705  ;;  %v624_v28 = vpop.f32.mrf.mxu1 }
 0x1c2   :  { %v900_v29 = vpop.eup %707  ;;  %v443_v30 = vpack.c.bf16 %v898_v27, %v896_v26  ;;  %v407_v42 = vadd.f32 %v624_v28, %v890_v11 }
 0x1c3   :  { %v904_v31 = vpop.eup %709  ;;  %v398_v32 = vpop.f32.mrf.mxu1 }
 0x1c4   :  { %v442_v33 = vpack.c.bf16 %v904_v31, %v900_v29  ;;  %v399_v47 = vadd.f32 %v890_v11, %v398_v32 }
 0x1c5   :  { %v627_v34 = vpop.f32.mrf.mxu1 }
 0x1c6   :  { %v420_v35 = vadd.f32 %v627_v34, %v890_v11 }
 0x1c7   :  { %v411_v36 = vpop.f32.mrf.mxu1 }
 0x1c8   :  { %711 = vtanh.f32 %v420_v35  ;;  %v412_v41 = vadd.f32 %v890_v11, %v411_v36 }
 0x1c9   :  { %v628_v37 = vpop.f32.mrf.mxu1 }
 0x1ca   :  { %v423_v38 = vadd.f32 %v628_v37, %v890_v11 }
 0x1cb   :  { %v414_v39 = vpop.f32.mrf.mxu1 }
 0x1cc   :  { %713 = vtanh.f32 %v423_v38  ;;  %v415_v40 = vadd.f32 %v890_v11, %v414_v39 }
 0x1ce   :  { %715 = vtanh.f32 %v415_v40 }
 0x1cf   :  { %717 = vtanh.f32 %v412_v41 }
 0x1d0   :  { %719 = vtanh.f32 %v407_v42 }
 0x1d1   :  { %721 = vtanh.f32 %v404_v44 }
 0x1d2   :  { %723 = vtanh.f32 %v399_v47 }
 0x1d3   :  { %725 = vtanh.f32 %v396_v49 }
 0x1d4   :  { %727 = vtanh.f32 %v391_v52 }
 0x1d5   :  { %v712_v43 = vpop.eup %711  ;;  %729 = vtanh.f32 %v388_v54 }
 0x1d6   :  { %731 = vtanh.f32 %v383_v57 }
 0x1d7   :  { %733 = vtanh.f32 %v380_v59 }
 0x1d9   :  { %v714_v45 = vpop.eup %713 }
 0x1da   :  { %v449_v46 = vpack.c.bf16 %v714_v45, %v712_v43 }
 0x1db   :  { %v716_v48 = vpop.eup %715 }
 0x1dc   :  { %630 = vmatpush3.bf16.xpose.msra.mxu0 %v449_v46  ;;  %v718_v50 = vpop.eup %717 }
 0x1dd   :  { %631 = vmatprep.subr.bf16.mxu0 %v780_v10  ;;  %v448_v51 = vpack.c.bf16 %v716_v48, %v718_v50  ;;  %v720_v53 = vpop.eup %719 }
 0x1de   :  { %v722_v55 = vpop.eup %721 }
 0x1df   :  { %v447_v56 = vpack.c.bf16 %v720_v53, %v722_v55  ;;  %v724_v58 = vpop.eup %723 }
 0x1e0   :  { %v726_v60 = vpop.eup %725 }
 0x1e1   :  { %v446_v61 = vpack.c.bf16 %v724_v58, %v726_v60  ;;  %v728_v62 = vpop.eup %727 }
 0x1e2   :  { %v730_v63 = vpop.eup %729 }
 0x1e3   :  { %v445_v0 = vpack.c.bf16 %v728_v62, %v730_v63  ;;  %v732_v1 = vpop.eup %731 }
 0x1e4   :  { %632 = vmatpush3.bf16.xpose.msra.mxu0 %v448_v51  ;;  %v734_v2 = vpop.eup %733 }
 0x1e5   :  { %633 = vmatprep.subr.bf16.mxu0 %v780_v10  ;;  %v444_v3 = vpack.c.bf16 %v732_v1, %v734_v2 }
 0x1ec   :  { %634 = vmatpush3.bf16.xpose.msra.mxu0 %v447_v56 }
 0x1ed   :  { %635 = vmatprep.subr.bf16.mxu0 %v780_v10 }
 0x1f4   :  { %636 = vmatpush3.bf16.xpose.msra.mxu0 %v446_v61 }
 0x1f5   :  { %637 = vmatprep.subr.bf16.mxu0 %v780_v10 }
 0x1fc   :  { %638 = vmatpush3.bf16.xpose.msra.mxu0 %v445_v0 }
 0x1fd   :  { %639 = vmatprep.subr.bf16.mxu0 %v780_v10 }
 0x204   :  { %640 = vmatpush3.bf16.xpose.msra.mxu0 %v444_v3 }
 0x205   :  { %641 = vmatprep.subr.bf16.mxu0 %v780_v10 }
 0x20c   :  { %642 = vmatpush3.bf16.xpose.msra.mxu0 %v443_v30 }
 0x20d   :  { %643 = vmatprep.subr.bf16.mxu0 %v780_v10 }
 0x214   :  { %644 = vmatpush3.bf16.xpose.msra.mxu0 %v442_v33 }
 0x21b   :  { %646 = vmatmul.mubr.bf16.vlgmr.msra.gmra.mxu0 %v670_v4 }
 0x2db   :  { %v492_v6 = vpop.f32.mrf.mxu0 }
 0x2dc   :  { %v500_v7 = vadd.f32 %v499_v5, %v492_v6 }
 0x2dd   :  { %v647_v8 = vpop.f32.mrf.mxu0 }
 0x2de   :  { %501 = vst [vmem:[#allocation6] sm:$0x1] %v500_v7 }
 0x2df   :  { %v495_v9 = vpop.f32.mrf.mxu0 }
 0x2e0   :  { %766 = shalt.err (!%p763_p9)
}
 0x2e1   :  { %511 = dma.vmem_to_hbm [thread:$0]  %s509_s18, 16, %s943_s7, [#allocation5]   ;;  %v648_v10 = vpop.f32.mrf.mxu0 }
 0x2e2   :  { %777 = dma.done.wait [#allocation5], 16  }
 0x2e3   :  { %778 = vsyncadd [#allocation5], 4294967280 }
 0x2e4   :  { %515 = vsyncpa [#allocation4], 1 }
 0x2e5   :  { %516 = vsyncpa [#allocation5], 1 }

</bundles_post_ra>
